<compile_context>
chip_gen: v7x
topology: tpu7x:2x2x1
jax: 0.10.0
libtpu: 0.0.40
codegen_flags: <defaults>
</compile_context>

<pallas_src>
import jax
import jax.numpy as jnp
from jax.experimental import pallas as pl
from jax.experimental.pallas import tpu as pltpu


# ----------------------- bilinear resize as a matmul -------------------------

def _interp_matrix_1d(in_size, out_size):
    """M (in_size, out_size): weight of source index i for output index o.
    Matches F.interpolate(mode='bilinear', align_corners=False)."""
    if in_size == out_size:
        return jnp.eye(in_size, dtype=jnp.float32)
    scale = in_size / out_size
    o = jnp.arange(out_size, dtype=jnp.float32)
    src = jnp.maximum((o + 0.5) * scale - 0.5, 0.0)
    lo = jnp.minimum(jnp.floor(src).astype(jnp.int32), in_size - 1)
    hi = jnp.minimum(lo + 1, in_size - 1)
    frac = src - lo.astype(jnp.float32)
    rows = jnp.arange(in_size, dtype=jnp.int32)[:, None]
    return (jnp.where(rows == lo[None, :], 1.0 - frac[None, :], 0.0)
            + jnp.where(rows == hi[None, :], frac[None, :], 0.0))


def _bilinear_matrix(in_h, in_w, out_h, out_w):
    """(in_h*in_w, out_h*out_w) separable bilinear interpolation matrix."""
    # TODO(synk): replace dense kron with separable two-matmul resize at
    # production HW sizes; at toy sizes the dense matrix is tiny and exact.
    return jnp.kron(_interp_matrix_1d(in_h, out_h),
                    _interp_matrix_1d(in_w, out_w))


# ----------------------------- spec helpers ----------------------------------

def _act_spec(c, hw):
    return pl.BlockSpec((1, c, hw), lambda b: (b, 0, 0))


def _param_spec(shape):
    zeros = (0,) * len(shape)
    return pl.BlockSpec(shape, lambda b, _z=zeros: _z)


# ------------------------------ fused kernel ---------------------------------

# Column layout of the packed per-channel vector array (C, 7):
_V_LFR_SH, _V_LFR_A, _V_SFU_SH, _V_SFU_A, _V_SFU_B2, _V_ST_SH, _V_FZ_SH = range(7)


def _bif_kernel(xd_ref, xs_ref, xu_ref,
                ms_ref, mu_ref,
                lw1_ref, lw2_ref, lw3_ref, lwf_ref,
                sw12_ref, stw_ref,
                fwd_ref, fwu_ref, fws_ref,
                vec_ref,
                o_ref):
    def mm(w_ref, x):
        # Weights are already bf16 (BN scale pre-folded); cast activation at the
        # MXU input only, accumulate in f32.
        return jnp.dot(w_ref[...], x.astype(jnp.bfloat16),
                       preferred_element_type=jnp.float32)

    C = vec_ref.shape[0]
    lfr_sh1 = vec_ref[:, _V_LFR_SH:_V_LFR_SH + 1]     # (C,1) folded-BN shift
    lfr_a1 = vec_ref[:, _V_LFR_A:_V_LFR_A + 1]        # (C,1) PReLU alpha
    sfu_sh1 = vec_ref[:, _V_SFU_SH:_V_SFU_SH + 1]
    sfu_a1 = vec_ref[:, _V_SFU_A:_V_SFU_A + 1]
    sfu_b2 = vec_ref[:, _V_SFU_B2:_V_SFU_B2 + 1]      # conv2 bias
    st_sh = vec_ref[:, _V_ST_SH:_V_ST_SH + 1]
    fz_sh = vec_ref[:, _V_FZ_SH:_V_FZ_SH + 1]

    # ---------------- LFRBlock (down branch, at HWd) ----------------
    xd = xd_ref[0]                                    # (Cd, HWd)
    h = mm(lw1_ref, xd) + lfr_sh1                     # conv1 + folded BN
    h = jnp.where(h >= 0.0, h, lfr_a1 * h)            # PReLU (per channel)
    g = jnp.mean(h, axis=1, keepdims=True)            # adaptive_avg_pool2d -> (C,1)
    fg = mm(lw2_ref, g)                               # conv2 on pooled vector (C,1)
    fl = jax.nn.sigmoid(mm(lw3_ref, h))               # conv3 + sigmoid (C,HWd)
    d = mm(lwf_ref, fg + fl)                          # fuse conv; fg broadcasts

    # ---------------- SFUBlock (up branch, at HWu) ----------------
    xu = xu_ref[0]                                    # (Cu, HWu)
    both = mm(sw12_ref, xu)                           # merged conv1|conv2 -> (2C, HWu)
    f = both[:C] + sfu_sh1                            # conv1 + folded BN
    f = jnp.where(f >= 0.0, f, sfu_a1 * f)            # PReLU
    logits = both[C:] + sfu_b2                        # conv2 (bias), softmax over channels
    logits = logits - jnp.max(logits, axis=0, keepdims=True)
    e = jnp.exp(logits)
    att = e / jnp.sum(e, axis=0, keepdims=True)       # exact division for parity
    u = f * att                                       # (C, HWu)

    # ---------------- st_feat (at HWs) ----------------
    s = mm(stw_ref, xs_ref[0]) + st_sh                # conv + folded BN -> (C, HWs)

    # -------- bilinear resize to d's spatial size (precomputed bf16 matrices) ----
    s_d = jnp.dot(s.astype(jnp.bfloat16), ms_ref[...],
                  preferred_element_type=jnp.float32)         # (C, HWd)
    u_d = jnp.dot(u.astype(jnp.bfloat16), mu_ref[...],
                  preferred_element_type=jnp.float32)         # (C, HWd)

    # ---------------- final fusion (3C->C conv split, no concat) ----------------
    fz = mm(fwd_ref, d) + mm(fwu_ref, u_d) + mm(fws_ref, s_d) + fz_sh
    o_ref[0] = fz + s_d * u_d + jax.nn.sigmoid(s_d * d)


# ------------------------------ parameters -----------------------------------

def _fold_bn(weight, bias, mean, var, eps=1e-5):
    scale = weight / jnp.sqrt(var + eps)
    shift = bias - mean * scale
    return scale, shift                               # (C,) each


def init_params(key, Cd, Cs, Cu, C):
    """Raw (PyTorch-equivalent) f32 parameters."""
    ks = iter(jax.random.split(key, 32))

    def w(shape):
        return 0.1 * jax.random.normal(next(ks), shape, jnp.float32)

    def bn(c):
        return dict(
            weight=1.0 + 0.1 * jax.random.normal(next(ks), (c,), jnp.float32),
            bias=0.1 * jax.random.normal(next(ks), (c,), jnp.float32),
            mean=0.1 * jax.random.normal(next(ks), (c,), jnp.float32),
            var=1.0 + 0.1 * jnp.abs(jax.random.normal(next(ks), (c,), jnp.float32)))

    return dict(
        # LFRBlock (down_feat); conv weights stored (Cout, Cin) for y = W @ x.
        lfr_w1=w((C, Cd)), lfr_bn1=bn(C), lfr_a1=jnp.full((C,), 0.25, jnp.float32),
        lfr_w2=w((C, C)), lfr_w3=w((C, C)), lfr_wf=w((C, C)),
        # SFUBlock (up_feat)
        sfu_w1=w((C, Cu)), sfu_bn1=bn(C), sfu_a1=jnp.full((C,), 0.25, jnp.float32),
        sfu_w2=w((C, Cu)),
        sfu_b2=0.1 * jax.random.normal(next(ks), (C,), jnp.float32),
        # st_feat
        st_w=w((C, Cs)), st_bn=bn(C),
        # fuse (3C -> C); columns follow the PyTorch cat order [d | u | s].
        fz_w=w((C, 3 * C)), fz_bn=bn(C),
    )


def prepare_params(raw, spatial):
    """Fold BN scales into conv weights, pre-cast matmul operands to bf16, pack
    per-channel shifts/alphas/bias into one (C, 7) array, and build the bf16
    resize matrices.  Runs once outside jit, so it is free at kernel run time."""
    (Hd, Wd), (Hs, Ws), (Hu, Wu) = spatial
    C = raw['st_w'].shape[0]
    bf = jnp.bfloat16

    lsc1, lsh1 = _fold_bn(**raw['lfr_bn1'])
    ssc1, ssh1 = _fold_bn(**raw['sfu_bn1'])
    tsc, tsh = _fold_bn(**raw['st_bn'])
    fsc, fsh = _fold_bn(**raw['fz_bn'])

    fz_w = fsc[:, None] * raw['fz_w']                  # BN scale folded into fuse conv

    vec = jnp.stack(
        [lsh1, raw['lfr_a1'], ssh1, raw['sfu_a1'], raw['sfu_b2'], tsh, fsh],
        axis=1).astype(jnp.float32)                    # (C, 7)

    return dict(
        lfr_w1=(lsc1[:, None] * raw['lfr_w1']).astype(bf),
        lfr_w2=raw['lfr_w2'].astype(bf),
        lfr_w3=raw['lfr_w3'].astype(bf),
        lfr_wf=raw['lfr_wf'].astype(bf),
        # SFU conv1/conv2 share the input -> one (2C, Cu) weight (rows [0:C]=conv1).
        sfu_w12=jnp.concatenate(
            [ssc1[:, None] * raw['sfu_w1'], raw['sfu_w2']], axis=0).astype(bf),
        st_w=(tsc[:, None] * raw['st_w']).astype(bf),
        # fuse conv split into the three column blocks matching cat([d, u, s], 1).
        fz_wd=fz_w[:, :C].astype(bf),
        fz_wu=fz_w[:, C:2 * C].astype(bf),
        fz_ws=fz_w[:, 2 * C:].astype(bf),
        vec=vec,
        m_s=_bilinear_matrix(Hs, Ws, Hd, Wd).astype(bf),
        m_u=_bilinear_matrix(Hu, Wu, Hd, Wd).astype(bf),
    )


# ------------------------------- forward -------------------------------------

def bif_forward(xd, xs, xu, p):
    B, Cd, Hd, Wd = xd.shape
    _, Cs, Hs, Ws = xs.shape
    _, Cu, Hu, Wu = xu.shape
    C = p['vec'].shape[0]
    HWd, HWs, HWu = Hd * Wd, Hs * Ws, Hu * Wu

    # NCHW -> (B, C, HW): pure reshape, no transpose.
    xd_r = xd.reshape(B, Cd, HWd)
    xs_r = xs.reshape(B, Cs, HWs)
    xu_r = xu.reshape(B, Cu, HWu)

    params = (p['m_s'], p['m_u'],
              p['lfr_w1'], p['lfr_w2'], p['lfr_w3'], p['lfr_wf'],
              p['sfu_w12'], p['st_w'],
              p['fz_wd'], p['fz_wu'], p['fz_ws'],
              p['vec'])

    out_rows = pl.pallas_call(
        _bif_kernel,
        out_shape=jax.ShapeDtypeStruct((B, C, HWd), jnp.float32),
        grid=(B,),
        in_specs=([_act_spec(Cd, HWd), _act_spec(Cs, HWs), _act_spec(Cu, HWu)]
                  + [_param_spec(q.shape) for q in params]),
        out_specs=_act_spec(C, HWd),
        compiler_params=pltpu.CompilerParams(
            dimension_semantics=("parallel",)),
    )(xd_r, xs_r, xu_r, *params)

    return out_rows.reshape(B, C, Hd, Wd)              # NCHW output


# --------------------------------- main ---------------------------------------

if __name__ == "__main__":
    key = jax.random.PRNGKey(0)
    k_xd, k_xs, k_xu, k_p = jax.random.split(key, 4)

    B = 2
    d_channels, s_channels, u_channels, out_channels = 4, 6, 8, 8
    Hd, Wd = 16, 16
    Hs, Ws = 8, 8
    Hu, Wu = 4, 4

    xd = jax.random.normal(k_xd, (B, d_channels, Hd, Wd), jnp.float32)
    xs = jax.random.normal(k_xs, (B, s_channels, Hs, Ws), jnp.float32)
    xu = jax.random.normal(k_xu, (B, u_channels, Hu, Wu), jnp.float32)

    raw = init_params(k_p, d_channels, s_channels, u_channels, out_channels)
    prepped = prepare_params(raw, ((Hd, Wd), (Hs, Ws), (Hu, Wu)))

    out = jax.jit(bif_forward)(xd, xs, xu, prepped)
    jax.block_until_ready(out)
    assert out.shape == (B, out_channels, Hd, Wd)
    print("KERNEL_OK")
</pallas_src>

<mosaic_0001>
module attributes {stable_mosaic.version = 11 : i64} {
  func.func @_bif_kernel(%arg0: i32, %arg1: memref<1x4x256xf32, #tpu.memory_space<vmem>>, %arg2: memref<1x6x64xf32, #tpu.memory_space<vmem>>, %arg3: memref<1x8x16xf32, #tpu.memory_space<vmem>>, %arg4: memref<64x256xbf16, #tpu.memory_space<vmem>>, %arg5: memref<16x256xbf16, #tpu.memory_space<vmem>>, %arg6: memref<8x4xbf16, #tpu.memory_space<vmem>>, %arg7: memref<8x8xbf16, #tpu.memory_space<vmem>>, %arg8: memref<8x8xbf16, #tpu.memory_space<vmem>>, %arg9: memref<8x8xbf16, #tpu.memory_space<vmem>>, %arg10: memref<16x8xbf16, #tpu.memory_space<vmem>>, %arg11: memref<8x6xbf16, #tpu.memory_space<vmem>>, %arg12: memref<8x8xbf16, #tpu.memory_space<vmem>>, %arg13: memref<8x8xbf16, #tpu.memory_space<vmem>>, %arg14: memref<8x8xbf16, #tpu.memory_space<vmem>>, %arg15: memref<8x7xf32, #tpu.memory_space<vmem>>, %arg16: memref<1x8x256xf32, #tpu.memory_space<vmem>>) attributes {dimension_semantics = [#tpu.dimension_semantics<parallel>], iteration_bounds = array<i64: 2>, scalar_prefetch = 0 : i64, scratch_operands = 0 : i64, tpu.core_type = #tpu.core_type<tc>, window_params = [{transform_indices = @transform_0, window_bounds = array<i64: 1, 4, 256>}, {transform_indices = @transform_1, window_bounds = array<i64: 1, 6, 64>}, {transform_indices = @transform_2, window_bounds = array<i64: 1, 8, 16>}, {pipeline_mode = #tpu.pipeline_mode<synchronous>, transform_indices = @transform_3, window_bounds = array<i64: 64, 256>}, {pipeline_mode = #tpu.pipeline_mode<synchronous>, transform_indices = @transform_4, window_bounds = array<i64: 16, 256>}, {pipeline_mode = #tpu.pipeline_mode<synchronous>, transform_indices = @transform_5, window_bounds = array<i64: 8, 4>}, {pipeline_mode = #tpu.pipeline_mode<synchronous>, transform_indices = @transform_6, window_bounds = array<i64: 8, 8>}, {pipeline_mode = #tpu.pipeline_mode<synchronous>, transform_indices = @transform_7, window_bounds = array<i64: 8, 8>}, {pipeline_mode = #tpu.pipeline_mode<synchronous>, transform_indices = @transform_8, window_bounds = array<i64: 8, 8>}, {pipeline_mode = #tpu.pipeline_mode<synchronous>, transform_indices = @transform_9, window_bounds = array<i64: 16, 8>}, {pipeline_mode = #tpu.pipeline_mode<synchronous>, transform_indices = @transform_10, window_bounds = array<i64: 8, 6>}, {pipeline_mode = #tpu.pipeline_mode<synchronous>, transform_indices = @transform_11, window_bounds = array<i64: 8, 8>}, {pipeline_mode = #tpu.pipeline_mode<synchronous>, transform_indices = @transform_12, window_bounds = array<i64: 8, 8>}, {pipeline_mode = #tpu.pipeline_mode<synchronous>, transform_indices = @transform_13, window_bounds = array<i64: 8, 8>}, {pipeline_mode = #tpu.pipeline_mode<synchronous>, transform_indices = @transform_14, window_bounds = array<i64: 8, 7>}, {transform_indices = @transform_15, window_bounds = array<i64: 1, 8, 256>}]} {
    %c0 = arith.constant 0 : index
    %c0_0 = arith.constant 0 : index
    %0 = vector.load %arg15[%c0, %c0_0] : memref<8x7xf32, #tpu.memory_space<vmem>>, vector<8x1xf32>
    %c0_1 = arith.constant 0 : index
    %c1 = arith.constant 1 : index
    %1 = vector.load %arg15[%c0_1, %c1] : memref<8x7xf32, #tpu.memory_space<vmem>>, vector<8x1xf32>
    %c0_2 = arith.constant 0 : index
    %c2 = arith.constant 2 : index
    %2 = vector.load %arg15[%c0_2, %c2] : memref<8x7xf32, #tpu.memory_space<vmem>>, vector<8x1xf32>
    %c0_3 = arith.constant 0 : index
    %c3 = arith.constant 3 : index
    %3 = vector.load %arg15[%c0_3, %c3] : memref<8x7xf32, #tpu.memory_space<vmem>>, vector<8x1xf32>
    %c0_4 = arith.constant 0 : index
    %c4 = arith.constant 4 : index
    %4 = vector.load %arg15[%c0_4, %c4] : memref<8x7xf32, #tpu.memory_space<vmem>>, vector<8x1xf32>
    %c0_5 = arith.constant 0 : index
    %c5 = arith.constant 5 : index
    %5 = vector.load %arg15[%c0_5, %c5] : memref<8x7xf32, #tpu.memory_space<vmem>>, vector<8x1xf32>
    %c0_6 = arith.constant 0 : index
    %c6 = arith.constant 6 : index
    %6 = vector.load %arg15[%c0_6, %c6] : memref<8x7xf32, #tpu.memory_space<vmem>>, vector<8x1xf32>
    %c0_7 = arith.constant 0 : index
    %c0_8 = arith.constant 0 : index
    %c0_9 = arith.constant 0 : index
    %7 = vector.load %arg1[%c0_7, %c0_8, %c0_9] : memref<1x4x256xf32, #tpu.memory_space<vmem>>, vector<1x4x256xf32>
    %8 = vector.shape_cast %7 : vector<1x4x256xf32> to vector<4x256xf32>
    %c0_10 = arith.constant 0 : index
    %c0_11 = arith.constant 0 : index
    %9 = vector.load %arg6[%c0_10, %c0_11] : memref<8x4xbf16, #tpu.memory_space<vmem>>, vector<8x4xbf16>
    %10 = arith.truncf %8 : vector<4x256xf32> to vector<4x256xbf16>
    %cst = arith.constant dense<0.000000e+00> : vector<8x256xf32>
    %11 = tpu.matmul %9, %10, %cst {dimension_numbers = #tpu.dot_dimension_numbers<[1], [0], [0], [1], [0, 0, 1, 1], [], []>} : vector<8x4xbf16>, vector<4x256xbf16>, vector<8x256xf32> -> vector<8x256xf32>
    %12 = vector.broadcast %0 : vector<8x1xf32> to vector<8x256xf32>
    %13 = arith.addf %11, %12 : vector<8x256xf32>
    %cst_12 = arith.constant 0.000000e+00 : f32
    %14 = vector.broadcast %cst_12 : f32 to vector<8x256xf32>
    %15 = arith.cmpf oge, %13, %14 : vector<8x256xf32>
    %16 = vector.broadcast %1 : vector<8x1xf32> to vector<8x256xf32>
    %17 = arith.mulf %16, %13 : vector<8x256xf32>
    %18 = arith.select %15, %13, %17 : vector<8x256xi1>, vector<8x256xf32>
    %cst_13 = arith.constant dense<0.000000e+00> : vector<8xf32>
    %19 = vector.multi_reduction <add>, %18, %cst_13 [1] : vector<8x256xf32> to vector<8xf32>
    %20 = vector.shape_cast %19 : vector<8xf32> to vector<8x1xf32>
    %cst_14 = arith.constant 2.560000e+02 : f32
    %21 = vector.broadcast %cst_14 : f32 to vector<8x1xf32>
    %22 = arith.divf %20, %21 : vector<8x1xf32>
    %c0_15 = arith.constant 0 : index
    %c0_16 = arith.constant 0 : index
    %23 = vector.load %arg7[%c0_15, %c0_16] : memref<8x8xbf16, #tpu.memory_space<vmem>>, vector<8x8xbf16>
    %24 = arith.truncf %22 : vector<8x1xf32> to vector<8x1xbf16>
    %cst_17 = arith.constant dense<0.000000e+00> : vector<8x1xf32>
    %25 = tpu.matmul %23, %24, %cst_17 {dimension_numbers = #tpu.dot_dimension_numbers<[1], [0], [0], [1], [0, 0, 1, 1], [], []>} : vector<8x8xbf16>, vector<8x1xbf16>, vector<8x1xf32> -> vector<8x1xf32>
    %c0_18 = arith.constant 0 : index
    %c0_19 = arith.constant 0 : index
    %26 = vector.load %arg8[%c0_18, %c0_19] : memref<8x8xbf16, #tpu.memory_space<vmem>>, vector<8x8xbf16>
    %27 = arith.truncf %18 : vector<8x256xf32> to vector<8x256xbf16>
    %cst_20 = arith.constant dense<0.000000e+00> : vector<8x256xf32>
    %28 = tpu.matmul %26, %27, %cst_20 {dimension_numbers = #tpu.dot_dimension_numbers<[1], [0], [0], [1], [0, 0, 1, 1], [], []>} : vector<8x8xbf16>, vector<8x256xbf16>, vector<8x256xf32> -> vector<8x256xf32>
    %29 = arith.negf %28 : vector<8x256xf32>
    %30 = math.exp %29 : vector<8x256xf32>
    %cst_21 = arith.constant 1.000000e+00 : f32
    %31 = vector.broadcast %cst_21 : f32 to vector<8x256xf32>
    %32 = arith.addf %31, %30 : vector<8x256xf32>
    %33 = arith.divf %31, %32 : vector<8x256xf32>
    %34 = vector.broadcast %25 : vector<8x1xf32> to vector<8x256xf32>
    %35 = arith.addf %34, %33 : vector<8x256xf32>
    %c0_22 = arith.constant 0 : index
    %c0_23 = arith.constant 0 : index
    %36 = vector.load %arg9[%c0_22, %c0_23] : memref<8x8xbf16, #tpu.memory_space<vmem>>, vector<8x8xbf16>
    %37 = arith.truncf %35 : vector<8x256xf32> to vector<8x256xbf16>
    %cst_24 = arith.constant dense<0.000000e+00> : vector<8x256xf32>
    %38 = tpu.matmul %36, %37, %cst_24 {dimension_numbers = #tpu.dot_dimension_numbers<[1], [0], [0], [1], [0, 0, 1, 1], [], []>} : vector<8x8xbf16>, vector<8x256xbf16>, vector<8x256xf32> -> vector<8x256xf32>
    %c0_25 = arith.constant 0 : index
    %c0_26 = arith.constant 0 : index
    %c0_27 = arith.constant 0 : index
    %39 = vector.load %arg3[%c0_25, %c0_26, %c0_27] : memref<1x8x16xf32, #tpu.memory_space<vmem>>, vector<1x8x16xf32>
    %40 = vector.shape_cast %39 : vector<1x8x16xf32> to vector<8x16xf32>
    %c0_28 = arith.constant 0 : index
    %c0_29 = arith.constant 0 : index
    %41 = vector.load %arg10[%c0_28, %c0_29] : memref<16x8xbf16, #tpu.memory_space<vmem>>, vector<16x8xbf16>
    %42 = arith.truncf %40 : vector<8x16xf32> to vector<8x16xbf16>
    %cst_30 = arith.constant dense<0.000000e+00> : vector<16x16xf32>
    %43 = tpu.matmul %41, %42, %cst_30 {dimension_numbers = #tpu.dot_dimension_numbers<[1], [0], [0], [1], [0, 0, 1, 1], [], []>} : vector<16x8xbf16>, vector<8x16xbf16>, vector<16x16xf32> -> vector<16x16xf32>
    %44 = vector.extract_strided_slice %43 {offsets = [0, 0], sizes = [8, 16], strides = [1, 1]} : vector<16x16xf32> to vector<8x16xf32>
    %45 = vector.broadcast %2 : vector<8x1xf32> to vector<8x16xf32>
    %46 = arith.addf %44, %45 : vector<8x16xf32>
    %cst_31 = arith.constant 0.000000e+00 : f32
    %47 = vector.broadcast %cst_31 : f32 to vector<8x16xf32>
    %48 = arith.cmpf oge, %46, %47 : vector<8x16xf32>
    %49 = vector.broadcast %3 : vector<8x1xf32> to vector<8x16xf32>
    %50 = arith.mulf %49, %46 : vector<8x16xf32>
    %51 = arith.select %48, %46, %50 : vector<8x16xi1>, vector<8x16xf32>
    %52 = vector.extract_strided_slice %43 {offsets = [8, 0], sizes = [8, 16], strides = [1, 1]} : vector<16x16xf32> to vector<8x16xf32>
    %53 = vector.broadcast %4 : vector<8x1xf32> to vector<8x16xf32>
    %54 = arith.addf %52, %53 : vector<8x16xf32>
    %cst_32 = arith.constant dense<0xFF800000> : vector<16xf32>
    %55 = vector.multi_reduction <maximumf>, %54, %cst_32 [0] : vector<8x16xf32> to vector<16xf32>
    %56 = vector.shape_cast %55 : vector<16xf32> to vector<1x16xf32>
    %57 = vector.broadcast %56 : vector<1x16xf32> to vector<8x16xf32>
    %58 = arith.subf %54, %57 : vector<8x16xf32>
    %59 = math.exp %58 : vector<8x16xf32>
    %cst_33 = arith.constant dense<0.000000e+00> : vector<16xf32>
    %60 = vector.multi_reduction <add>, %59, %cst_33 [0] : vector<8x16xf32> to vector<16xf32>
    %61 = vector.shape_cast %60 : vector<16xf32> to vector<1x16xf32>
    %62 = vector.broadcast %61 : vector<1x16xf32> to vector<8x16xf32>
    %63 = arith.divf %59, %62 : vector<8x16xf32>
    %64 = arith.mulf %51, %63 : vector<8x16xf32>
    %c0_34 = arith.constant 0 : index
    %c0_35 = arith.constant 0 : index
    %c0_36 = arith.constant 0 : index
    %65 = vector.load %arg2[%c0_34, %c0_35, %c0_36] : memref<1x6x64xf32, #tpu.memory_space<vmem>>, vector<1x6x64xf32>
    %66 = vector.shape_cast %65 : vector<1x6x64xf32> to vector<6x64xf32>
    %c0_37 = arith.constant 0 : index
    %c0_38 = arith.constant 0 : index
    %67 = vector.load %arg11[%c0_37, %c0_38] : memref<8x6xbf16, #tpu.memory_space<vmem>>, vector<8x6xbf16>
    %68 = arith.truncf %66 : vector<6x64xf32> to vector<6x64xbf16>
    %cst_39 = arith.constant dense<0.000000e+00> : vector<8x64xf32>
    %69 = tpu.matmul %67, %68, %cst_39 {dimension_numbers = #tpu.dot_dimension_numbers<[1], [0], [0], [1], [0, 0, 1, 1], [], []>} : vector<8x6xbf16>, vector<6x64xbf16>, vector<8x64xf32> -> vector<8x64xf32>
    %70 = vector.broadcast %5 : vector<8x1xf32> to vector<8x64xf32>
    %71 = arith.addf %69, %70 : vector<8x64xf32>
    %72 = arith.truncf %71 : vector<8x64xf32> to vector<8x64xbf16>
    %c0_40 = arith.constant 0 : index
    %c0_41 = arith.constant 0 : index
    %73 = vector.load %arg4[%c0_40, %c0_41] : memref<64x256xbf16, #tpu.memory_space<vmem>>, vector<64x256xbf16>
    %cst_42 = arith.constant dense<0.000000e+00> : vector<8x256xf32>
    %74 = tpu.matmul %72, %73, %cst_42 {dimension_numbers = #tpu.dot_dimension_numbers<[1], [0], [0], [1], [0, 0, 1, 1], [], []>} : vector<8x64xbf16>, vector<64x256xbf16>, vector<8x256xf32> -> vector<8x256xf32>
    %75 = arith.truncf %64 : vector<8x16xf32> to vector<8x16xbf16>
    %c0_43 = arith.constant 0 : index
    %c0_44 = arith.constant 0 : index
    %76 = vector.load %arg5[%c0_43, %c0_44] : memref<16x256xbf16, #tpu.memory_space<vmem>>, vector<16x256xbf16>
    %cst_45 = arith.constant dense<0.000000e+00> : vector<8x256xf32>
    %77 = tpu.matmul %75, %76, %cst_45 {dimension_numbers = #tpu.dot_dimension_numbers<[1], [0], [0], [1], [0, 0, 1, 1], [], []>} : vector<8x16xbf16>, vector<16x256xbf16>, vector<8x256xf32> -> vector<8x256xf32>
    %c0_46 = arith.constant 0 : index
    %c0_47 = arith.constant 0 : index
    %78 = vector.load %arg12[%c0_46, %c0_47] : memref<8x8xbf16, #tpu.memory_space<vmem>>, vector<8x8xbf16>
    %79 = arith.truncf %38 : vector<8x256xf32> to vector<8x256xbf16>
    %cst_48 = arith.constant dense<0.000000e+00> : vector<8x256xf32>
    %80 = tpu.matmul %78, %79, %cst_48 {dimension_numbers = #tpu.dot_dimension_numbers<[1], [0], [0], [1], [0, 0, 1, 1], [], []>} : vector<8x8xbf16>, vector<8x256xbf16>, vector<8x256xf32> -> vector<8x256xf32>
    %c0_49 = arith.constant 0 : index
    %c0_50 = arith.constant 0 : index
    %81 = vector.load %arg13[%c0_49, %c0_50] : memref<8x8xbf16, #tpu.memory_space<vmem>>, vector<8x8xbf16>
    %82 = arith.truncf %77 : vector<8x256xf32> to vector<8x256xbf16>
    %cst_51 = arith.constant dense<0.000000e+00> : vector<8x256xf32>
    %83 = tpu.matmul %81, %82, %cst_51 {dimension_numbers = #tpu.dot_dimension_numbers<[1], [0], [0], [1], [0, 0, 1, 1], [], []>} : vector<8x8xbf16>, vector<8x256xbf16>, vector<8x256xf32> -> vector<8x256xf32>
    %84 = arith.addf %80, %83 : vector<8x256xf32>
    %c0_52 = arith.constant 0 : index
    %c0_53 = arith.constant 0 : index
    %85 = vector.load %arg14[%c0_52, %c0_53] : memref<8x8xbf16, #tpu.memory_space<vmem>>, vector<8x8xbf16>
    %86 = arith.truncf %74 : vector<8x256xf32> to vector<8x256xbf16>
    %cst_54 = arith.constant dense<0.000000e+00> : vector<8x256xf32>
    %87 = tpu.matmul %85, %86, %cst_54 {dimension_numbers = #tpu.dot_dimension_numbers<[1], [0], [0], [1], [0, 0, 1, 1], [], []>} : vector<8x8xbf16>, vector<8x256xbf16>, vector<8x256xf32> -> vector<8x256xf32>
    %88 = arith.addf %84, %87 : vector<8x256xf32>
    %89 = vector.broadcast %6 : vector<8x1xf32> to vector<8x256xf32>
    %90 = arith.addf %88, %89 : vector<8x256xf32>
    %91 = arith.mulf %74, %77 : vector<8x256xf32>
    %92 = arith.addf %90, %91 : vector<8x256xf32>
    %93 = arith.mulf %74, %38 : vector<8x256xf32>
    %94 = arith.negf %93 : vector<8x256xf32>
    %95 = math.exp %94 : vector<8x256xf32>
    %cst_55 = arith.constant 1.000000e+00 : f32
    %96 = vector.broadcast %cst_55 : f32 to vector<8x256xf32>
    %97 = arith.addf %96, %95 : vector<8x256xf32>
    %98 = arith.divf %96, %97 : vector<8x256xf32>
    %99 = arith.addf %92, %98 : vector<8x256xf32>
    %c0_56 = arith.constant 0 : index
    %c0_57 = arith.constant 0 : index
    %c0_58 = arith.constant 0 : index
    %100 = vector.load %arg16[%c0_56, %c0_57, %c0_58] : memref<1x8x256xf32, #tpu.memory_space<vmem>>, vector<1x8x256xf32>
    %101 = vector.shape_cast %100 : vector<1x8x256xf32> to vector<8x256xf32>
    %102 = vector.shape_cast %99 : vector<8x256xf32> to vector<1x8x256xf32>
    tpu.vector_store %arg16[%c0_56, %c0_57, %c0_58], %102 {strides = array<i32>} : memref<1x8x256xf32, #tpu.memory_space<vmem>>, vector<1x8x256xf32>,
    return
  }
  func.func @transform_0(%arg0: i32) -> (i32, i32, i32) {
    %c0_i32 = arith.constant 0 : i32
    %c0_i32_0 = arith.constant 0 : i32
    %c0_i32_1 = arith.constant 0 : i32
    return %arg0, %c0_i32, %c0_i32_0 : i32, i32, i32
  }
  func.func @transform_1(%arg0: i32) -> (i32, i32, i32) {
    %c0_i32 = arith.constant 0 : i32
    %c0_i32_0 = arith.constant 0 : i32
    %c0_i32_1 = arith.constant 0 : i32
    return %arg0, %c0_i32, %c0_i32_0 : i32, i32, i32
  }
  func.func @transform_2(%arg0: i32) -> (i32, i32, i32) {
    %c0_i32 = arith.constant 0 : i32
    %c0_i32_0 = arith.constant 0 : i32
    %c0_i32_1 = arith.constant 0 : i32
    return %arg0, %c0_i32, %c0_i32_0 : i32, i32, i32
  }
  func.func @transform_3(%arg0: i32) -> (i32, i32) {
    %c0_i32 = arith.constant 0 : i32
    %c0_i32_0 = arith.constant 0 : i32
    %c0_i32_1 = arith.constant 0 : i32
    return %c0_i32, %c0_i32_0 : i32, i32
  }
  func.func @transform_4(%arg0: i32) -> (i32, i32) {
    %c0_i32 = arith.constant 0 : i32
    %c0_i32_0 = arith.constant 0 : i32
    %c0_i32_1 = arith.constant 0 : i32
    return %c0_i32, %c0_i32_0 : i32, i32
  }
  func.func @transform_5(%arg0: i32) -> (i32, i32) {
    %c0_i32 = arith.constant 0 : i32
    %c0_i32_0 = arith.constant 0 : i32
    %c0_i32_1 = arith.constant 0 : i32
    return %c0_i32, %c0_i32_0 : i32, i32
  }
  func.func @transform_6(%arg0: i32) -> (i32, i32) {
    %c0_i32 = arith.constant 0 : i32
    %c0_i32_0 = arith.constant 0 : i32
    %c0_i32_1 = arith.constant 0 : i32
    return %c0_i32, %c0_i32_0 : i32, i32
  }
  func.func @transform_7(%arg0: i32) -> (i32, i32) {
    %c0_i32 = arith.constant 0 : i32
    %c0_i32_0 = arith.constant 0 : i32
    %c0_i32_1 = arith.constant 0 : i32
    return %c0_i32, %c0_i32_0 : i32, i32
  }
  func.func @transform_8(%arg0: i32) -> (i32, i32) {
    %c0_i32 = arith.constant 0 : i32
    %c0_i32_0 = arith.constant 0 : i32
    %c0_i32_1 = arith.constant 0 : i32
    return %c0_i32, %c0_i32_0 : i32, i32
  }
  func.func @transform_9(%arg0: i32) -> (i32, i32) {
    %c0_i32 = arith.constant 0 : i32
    %c0_i32_0 = arith.constant 0 : i32
    %c0_i32_1 = arith.constant 0 : i32
    return %c0_i32, %c0_i32_0 : i32, i32
  }
  func.func @transform_10(%arg0: i32) -> (i32, i32) {
    %c0_i32 = arith.constant 0 : i32
    %c0_i32_0 = arith.constant 0 : i32
    %c0_i32_1 = arith.constant 0 : i32
    return %c0_i32, %c0_i32_0 : i32, i32
  }
  func.func @transform_11(%arg0: i32) -> (i32, i32) {
    %c0_i32 = arith.constant 0 : i32
    %c0_i32_0 = arith.constant 0 : i32
    %c0_i32_1 = arith.constant 0 : i32
    return %c0_i32, %c0_i32_0 : i32, i32
  }
  func.func @transform_12(%arg0: i32) -> (i32, i32) {
    %c0_i32 = arith.constant 0 : i32
    %c0_i32_0 = arith.constant 0 : i32
    %c0_i32_1 = arith.constant 0 : i32
    return %c0_i32, %c0_i32_0 : i32, i32
  }
  func.func @transform_13(%arg0: i32) -> (i32, i32) {
    %c0_i32 = arith.constant 0 : i32
    %c0_i32_0 = arith.constant 0 : i32
    %c0_i32_1 = arith.constant 0 : i32
    return %c0_i32, %c0_i32_0 : i32, i32
  }
  func.func @transform_14(%arg0: i32) -> (i32, i32) {
    %c0_i32 = arith.constant 0 : i32
    %c0_i32_0 = arith.constant 0 : i32
    %c0_i32_1 = arith.constant 0 : i32
    return %c0_i32, %c0_i32_0 : i32, i32
  }
  func.func @transform_15(%arg0: i32) -> (i32, i32, i32) {
    %c0_i32 = arith.constant 0 : i32
    %c0_i32_0 = arith.constant 0 : i32
    %c0_i32_1 = arith.constant 0 : i32
    return %arg0, %c0_i32, %c0_i32_0 : i32, i32, i32
  }
}

</mosaic_0001>

<bundles_post_ra>
// kernel: bif_forward.1
= control target key start
LH: loop header
LB: loop body
LE: loop exit
PB: predicated region body
PF: predicated region fallthrough
CT: control target
= control target key end

     0   :  { %s1583_s18 = smov 0   ;;  %s1728_s0 = inlined_call_operand.vmem [shape: f32[2,4,256], index: 0, kind: input, shape index: {}]   ;;  %s1729_s1 = inlined_call_operand.vmem [shape: f32[2,6,64], index: 1, kind: input, shape index: {}]   ;;  %s1730_s2 = inlined_call_operand.vmem [shape: f32[2,8,16], index: 2, kind: input, shape index: {}]   ;;  %s1731_s3 = inlined_call_operand.vmem [shape: bf16[64,256], index: 3, kind: input, shape index: {}]   ;;  %s1732_s4 = inlined_call_operand.vmem [shape: bf16[16,256], index: 4, kind: input, shape index: {}]   ;;  %s1733_s5 = inlined_call_operand.vmem [shape: bf16[8,4], index: 5, kind: input, shape index: {}]   ;;  %s1734_s6 = inlined_call_operand.vmem [shape: bf16[8,8], index: 6, kind: input, shape index: {}]   ;;  %s1735_s7 = inlined_call_operand.vmem [shape: bf16[8,8], index: 7, kind: input, shape index: {}]   ;;  %s1736_s8 = inlined_call_operand.vmem [shape: bf16[8,8], index: 8, kind: input, shape index: {}]   ;;  %s1737_s9 = inlined_call_operand.vmem [shape: bf16[16,8], index: 9, kind: input, shape index: {}]   ;;  %s1738_s10 = inlined_call_operand.vmem [shape: bf16[8,6], index: 10, kind: input, shape index: {}]   ;;  %s1739_s11 = inlined_call_operand.vmem [shape: bf16[8,8], index: 11, kind: input, shape index: {}]   ;;  %s1740_s12 = inlined_call_operand.vmem [shape: bf16[8,8], index: 12, kind: input, shape index: {}]   ;;  %s1741_s13 = inlined_call_operand.vmem [shape: bf16[8,8], index: 13, kind: input, shape index: {}]   ;;  %s1742_s14 = inlined_call_operand.vmem [shape: f32[8,7], index: 14, kind: input, shape index: {}]   ;;  %s1743_s15 = inlined_call_operand.vmem [shape: f32[2,8,256], index: 15, kind: output, shape index: {}]  }
   0x1 LB: > { %s1353_s19 = sadd.s32 4294967295, %s1492_s18   ;;  %p1357_p0 = scmp.ge.s32.totalorder %s1492_s18, 1  ;;  %s1492_s18 = sphi %s1583_s18, %s25_s18  }
   0x2   : > { %p455_p1 = scmp.lt.s32.totalorder %s1492_s18, 3 }
   0x4   : > { %p456_p2 = pnand %p1357_p0, %p455_p1 }
   0x5   : > { %p511_p3 = scmp.lt.s32.totalorder (!%p456_p2), %s1353_s19, 1  ;;  %v1494_v0 = vmov (!%p456_p2), 0   ;;  %v1596_v1 = vld [vmem:[%s1742_s14] sm:$0xff] (!%p456_p2)  ;;  %vm547_vm0 = vcmask (!%p456_p2), 1041408   ;;  %v1495_v3 = vmov (!%p456_p2), 1   ;;  %vm543_vm1 = vcmask (!%p456_p2), 31744  }
   0x6   : > { %459 = sbr.rel (%p456_p2) target bundleno = 1408 (0x580), region = 80  ;;  %586 = vmatprep.mubr.bf16.mxu0 (!%p456_p2), %v1494_v0  ;;  %1441 = vset.pattern.permute.xlu0 (!%p456_p2), %v1494_v0  ;;  %v532_v8 = vld [vmem:[%s1733_s5] sm:$0xf] (!%p456_p2)  ;;  %vm616_vm4 = vcmask (!%p456_p2), 1043456   ;;  %v1496_v25 = vmov (!%p456_p2), 0.0   ;;  %vm1497_vm5 = vmmov (!%p456_p2), 0  }
   0x7   : > { %540 = vperm.xlu0 (!%p456_p2), %1441, %v1596_v1   ;;  %1443 = vset.pattern.permute.xlu1 (!%p456_p2), %v1494_v0  ;;  %vm612_vm6 = vcmask (!%p456_p2), 64512   ;;  %v660_v26 = vld [vmem:[%s1735_s7] sm:$0xf] (!%p456_p2)  ;;  %v1498_v35 = vmov (!%p456_p2), 4   ;;  %v1499_v45 = vmov (!%p456_p2), 2   ;;  %v1500_v46 = vmov (!%p456_p2), 3  }
   0x8   : > { %1406 = vmatprep.subr.bf16.mxu1 (!%p456_p2), %v1496_v25  ;;  %1408 = vmatprep.mubr.msk.bf16.mxu1 (!%p456_p2), %vm1497_vm5, %v1496_v25  ;;  %v610_v31 = vld [vmem:[%s1734_s6] sm:$0xf] (!%p456_p2)  ;;  %v1501_v47 = vmov (!%p456_p2), 5   ;;  %v1456_v49 = vld [vmem:[%s1731_s3 + $0x4] ss:$8 sps:$4 sm:$0xff] (!%p456_p2)   ;;  %vm858_vm7 = vcmask (!%p456_p2), 130048  }
   0x9   : > { %v1450_v40 = vld [vmem:[%s1737_s9] sm:$0xff] (!%p456_p2)   ;;  %v1459_v50 = vld [vmem:[%s1731_s3 + $0x14] ss:$8 sps:$4 sm:$0xff] (!%p456_p2)   ;;  %v1457_v51 = vld [vmem:[%s1731_s3 + $0x10] ss:$8 sps:$4 sm:$0xff] (!%p456_p2)   ;;  %vm890_vm8 = vcmask (!%p456_p2), 1042432  }
   0xa   : > { %v1454_v48 = vld [vmem:[%s1731_s3] ss:$8 sps:$4 sm:$0xff] (!%p456_p2)   ;;  %v1462_v52 = vld [vmem:[%s1731_s3 + $0x24] ss:$8 sps:$4 sm:$0xff] (!%p456_p2)   ;;  %vm886_vm9 = vcmask (!%p456_p2), 48128   ;;  %vm983_vm11 = vcmask (!%p456_p2), 523264  }
   0xb   : > { %1442 = vset.pattern.permute.xlu0 (!%p456_p2), %v1495_v3  ;;  %v1460_v53 = vld [vmem:[%s1731_s3 + $0x20] ss:$8 sps:$4 sm:$0xff] (!%p456_p2)  }
   0xc   : > { %598 = vperm.xlu0 (!%p456_p2), %1442, %v1596_v1  }
   0xd   : > { %s1745_s19 = smov (!%p511_p3, %s1353_s19), 1 }
   0xe   : > { %s1603_s22 = sshll.u32 %s1745_s19, 3  ;;  %s1399_s17 = sshll.u32 %s1745_s19, 4 }
   0xf   : > { %s515_s25 = scalar_lea.vmem %s1728_s0, %s1603_s22  ;;  %s523_s21 = scalar_lea.vmem %s1730_s2, %s1603_s22 }
  0x10   : > { %v531_v2 = vld [vmem:[%s515_s25] sm:$0xff]  ;;  %1444 = vset.pattern.permute.xlu0 %v1498_v35  ;;  %s519_s27 = scalar_lea.vmem %s1729_s1, %s1603_s22  ;;  %s528_s23 = scalar_lea.vmem %s1743_s15, %s1399_s17 }
  0x11   : > { %v534_v4 = vcombine.high %v531_v2, %v531_v2  ;;  %v536_v5 = vpack.c.bf16 %v531_v2, %v531_v2  ;;  %v785_v33 = vld [vmem:[%s523_s21] sm:$0xff]  ;;  %854 = vperm.xlu0 %1444, %v1596_v1  }
  0x12   : > { %v788_v36 = vpack.c.bf16 %v785_v33, %v785_v33  ;;  %v880_v35 = vld [vmem:[%s1738_s10] sm:$0xf] }
  0x13   : > { %v537_v6 = vpack.c.bf16 %v534_v4, %v534_v4  ;;  %v549_v7 = vsel %vm547_vm0, %v536_v5, 0 }
  0x14   : > { %v798_v39 = vsel %vm616_vm4, %v788_v36, 0  ;;  %v1451_v36 = vld [vmem:[%s1732_s4] ss:$8 sps:$4 sm:$0xff]  }
  0x15   : > { %1364 = vmatprep.subr.msk.bf16.mxu0 %vm547_vm0, %v537_v6  ;;  %1445 = vset.pattern.permute.xlu0 %v1499_v45  ;;  %v1465_v45 = vld [vmem:[%s1731_s3 + $0x34] ss:$8 sps:$4 sm:$0xff]  }
  0x16   : > { %555 = vmatpush1.bf16.msra.mxu0 %v549_v7  ;;  %842 = vperm.xlu0 %1445, %v1596_v1  }
  0x19   : > { %1365 = vmatmul.mubr.msk.bf16.vlgmr.msra.gmra.mrb[0].mxu0 %vm543_vm1, %v532_v8 }
  0x1a   : > { %704 = vmatprep.mubr.bf16.mxu0 %v1494_v0 }
  0x86   : > { %v541_v9 = vpop.permute.xlu0 %540 }
  0x8b   : > { %v599_v11 = vpop.permute.xlu0 %598 }
  0x90   : > { %v855_v57 = vpop.permute.xlu0 %854 }
  0xec   : > { %v588_v10 = vpop.f32.mrb[0].mxu0 }
  0xed   : > { %v589_v12 = vadd.f32 %v588_v10, %v541_v9  ;;  %v590_v13 = vpop.f32.mrb[1].mxu0 }
  0xee   : > { %v591_v14 = vadd.f32 %v590_v13, %v541_v9  ;;  %v592_v15 = vpop.f32.mrb[2].mxu0 }
  0xef   : > { %v601_v16 = vmul.f32 %v599_v11, %v589_v12  ;;  %v593_v17 = vpop.f32.mrb[3].mxu0  ;;  %vm595_vm2 = vcmp.ge.f32.partialorder %v589_v12, 0.0 }
  0xf0   : > { %vm596_vm3 = vcmp.ge.f32.partialorder %v591_v14, 0.0  ;;  %v602_v18 = vmul.f32 %v599_v11, %v591_v14 }
  0xf1   : > { %v603_v19 = vsel %vm595_vm2, %v589_v12, %v601_v16 }
  0xf2   : > { %v604_v20 = vsel %vm596_vm3, %v591_v14, %v602_v18  ;;  %v661_v21 = vpack.c.bf16 %v603_v19, %v603_v19  ;;  %v879_v18 = vld [vmem:[%s519_s27] sm:$0x3f] }
  0xf3   : > { %v662_v22 = vpack.c.bf16 %v604_v20, %v604_v20  ;;  %v605_v23 = vadd.f32 %v604_v20, %v603_v19 }
  0xf4   : > { %v667_v24 = vsel %vm616_vm4, %v661_v21, 0 }
  0xf5   : > { %1367 = vmatprep.subr.msk.bf16.mxu0 %vm616_vm4, %v662_v22  ;;  %606 = vadd.xlane.f32.xlu1 %v605_v23 }
  0xf6   : > { %673 = vmatpush1.bf16.msra.mxu0 %v667_v24 }
  0xf7   : > { %1412 = vmatprep.subr.bf16.mxu0 %v1496_v25 }
  0xf9   : > { %1368 = vmatmul.mubr.msk.bf16.vlgmr.msra.gmra.mrb[4].mxu0 %vm612_vm6, %v660_v26  ;;  %v881_v26 = vpack.c.bf16 %v879_v18, %v879_v18 }
  0xfa   : > { %1414 = vmatprep.mubr.msk.bf16.mxu0 %vm1497_vm5, %v1496_v25  ;;  %1413 = vmatpush3.bf16.msra.mxu0 %v798_v39 }
  0xfb   : > { %987 = vmatprep.subr.bf16.mxu0 %v1456_v49 }
 0x101   : > { %1415 = vmatmul.mubr.msk.bf16.vlgmr.msra.gmra.mrb[8].mxu0 %vm612_vm6, %v1450_v40 }
 0x102   : > { %1019 = vmatprep.mubr.bf16.mxu0 %v1494_v0  ;;  %988 = vmatpush1.bf16.msra.mxu0 %v1454_v48 }
 0x103   : > { %989 = vmatprep.subr.bf16.mxu0 %v1459_v50 }
 0x106   : > { %990 = vmatpush1.bf16.msra.mxu0 %v1457_v51 }
 0x107   : > { %991 = vmatprep.subr.bf16.mxu0 %v1462_v52 }
 0x10a   : > { %992 = vmatpush1.bf16.msra.mxu0 %v1460_v53 }
 0x10b   : > { %993 = vmatprep.subr.bf16.mxu0 %v1465_v45 }
 0x182   : > { %v607_v27 = vpop.xlane.xlu1 %606 }
 0x183   : > { %v609_v28 = vmul.f32 0.00390625, %v607_v27 }
 0x185   : > { %v611_v29 = vpack.c.bf16 %v609_v28, %v609_v28 }
 0x187   : > { %v618_v30 = vsel %vm616_vm4, %v611_v29, 0  ;;  %v732_v29 = vld [vmem:[%s1736_s8] sm:$0xf] }
 0x188   : > { %1407 = vmatpush3.bf16.msra.mxu1 %v618_v30 }
 0x18b   : > { %1409 = vmatmul.mubr.msk.bf16.vlgmr.msra.gmra.mrb[0].mxu1 %vm612_vm6, %v610_v31  ;;  %v892_v31 = vsel %vm890_vm8, %v881_v26, 0 }
 0x18c   : > { %776 = vmatprep.mubr.bf16.mxu1 %v1494_v0 }
 0x1cc   : > { %v706_v32 = vpop.f32.mrb[4].mxu0 }
 0x1cd   : > { %v708_v34 = vpop.f32.mrb[5].mxu0  ;;  %v1369_v54 = vmul.f32 -1.442695, %v706_v32  ;;  %v1453_v32 = vld [vmem:[%s1732_s4 + $0x4] ss:$8 sps:$4 sm:$0xff]  }
 0x1ce   : > { %v710_v37 = vpop.f32.mrb[6].mxu0  ;;  %v1370_v55 = vmul.f32 -1.442695, %v708_v34 }
 0x1cf   : > { %v711_v38 = vpop.f32.mrb[7].mxu0  ;;  %1466 = vpow2.f32 %v1369_v54  ;;  %v843_v37 = vpop.permute.xlu0 %842 }
 0x1d0   : > { %1468 = vpow2.f32 %v1370_v55 }
 0x1d4   : > { %v1664_v56 = vpop.f32.mrb[8].mxu0 }
 0x1d5   : > { %v1416_v58 = vpop.f32.mrb[9].mxu0 }
 0x1d6   : > { %v837_v59 = vpop.f32.mrb[10].mxu0 }
 0x1d7   : > { %v857_v60 = vadd.f32 %v855_v57, %v837_v59  ;;  %v1417_v61 = vpop.f32.mrb[11].mxu0 }
 0x1d9   : > { %v859_v62 = vsel %vm858_vm7, %v857_v60, -inf  ;;  %v1467_v5 = vpop.eup %1466 }
 0x1da   : > { %v860_v63 = vrot.slane %v859_v62, 4  ;;  %v1469_v6 = vpop.eup %1468  ;;  %v719_v8 = vadd.f32 1.0, %v1467_v5 }
 0x1db   : > { %v720_v10 = vadd.f32 1.0, %v1469_v6  ;;  %v1088_v6 = vld [vmem:[%s1740_s12] sm:$0xf] }
 0x1dc   : > { %v861_v2 = vmax.f32 %v859_v62, %v860_v63  ;;  %1470 = vrcp.f32 %v719_v8  ;;  %v1502_v8 = vmov 6  }
 0x1dd   : > { %1472 = vrcp.f32 %v720_v10  ;;  %1448 = vset.pattern.permute.xlu0 %v1502_v8 }
 0x1de   : > { %v862_v3 = vrot.slane %v861_v2, 2  ;;  %1247 = vperm.xlu0 %1448, %v1596_v1  }
 0x1e0   : > { %v863_v4 = vmax.f32 %v861_v2, %v862_v3 }
 0x1e2   : > { %v864_v7 = vrot.slane %v863_v4, 1 }
 0x1e4   : > { %v865_v9 = vmax.f32 %v863_v4, %v864_v7  ;;  %v1085_v7 = vld [vmem:[%s1739_s11] sm:$0xf] }
 0x1e6   : > { %v866_v11 = vsub.f32 %v857_v60, %v865_v9  ;;  %v1471_v13 = vpop.eup %1470 }
 0x1e7   : > { %v1473_v14 = vpop.eup %1472 }
 0x1e8   : > { %v867_v12 = vmul.f32 1.442695, %v866_v11 }
 0x1ea   : > { %1474 = vpow2.f32 %v867_v12 }
 0x1f4   : > { %v1475_v15 = vpop.eup %1474 }
 0x1f5   : > { %v869_v16 = vsel %vm858_vm7, %v1475_v15, 0.0 }
 0x1f6   : > { %v870_v19 = vrot.slane %v869_v16, 4 }
 0x1f8   : > { %v871_v22 = vadd.f32 %v870_v19, %v869_v16 }
 0x1fa   : > { %v872_v27 = vrot.slane %v871_v22, 2 }
 0x1fc   : > { %v873_v30 = vadd.f32 %v872_v27, %v871_v22 }
 0x1fe   : > { %v874_v33 = vrot.slane %v873_v30, 1 }
 0x200   : > { %v875_v34 = vadd.f32 %v874_v33, %v873_v30 }
 0x202   : > { %1476 = vrcp.f32 %v875_v34 }
 0x20c   : > { %v1477_v40 = vpop.eup %1476 }
 0x25e   : > { %v654_v41 = vpop.f32.mrb[0].mxu1 }
 0x25f   : > { %727 = vperm.xlu1 %1443, %v654_v41   ;;  %v1410_v42 = vpop.f32.mrb[1].mxu1  ;;  %v877_v41 = vmul.f32 %v1477_v40, %v1475_v15 }
 0x260   : > { %v657_v43 = vpop.f32.mrb[2].mxu1 }
 0x261   : > { %v1411_v44 = vpop.f32.mrb[3].mxu1 }
 0x263   : > { %1446 = vset.pattern.permute.xlu1 %v1500_v46  ;;  %v1463_v46 = vld [vmem:[%s1731_s3 + $0x30] ss:$8 sps:$4 sm:$0xff]  }
 0x264   : > { %848 = vperm.xlu1 %1446, %v1596_v1   ;;  %994 = vmatpush1.bf16.msra.mxu0 %v1463_v46 }
 0x268   : > { %1447 = vset.pattern.permute.xlu1 %v1501_v47 }
 0x269   : > { %883 = vperm.xlu1 %1447, %v1596_v1  }
 0x2de   : > { %v728_v17 = vpop.permute.xlu1 %727 }
 0x2df   : > { %v730_v20 = vadd.f32 %v1471_v13, %v728_v17  ;;  %v731_v21 = vadd.f32 %v1473_v14, %v728_v17 }
 0x2e1   : > { %v733_v23 = vpack.c.bf16 %v730_v20, %v730_v20  ;;  %v734_v24 = vpack.c.bf16 %v731_v21, %v731_v21 }
 0x2e3   : > { %1371 = vmatprep.subr.msk.bf16.mxu1 %vm616_vm4, %v734_v24  ;;  %v739_v28 = vsel %vm616_vm4, %v733_v23, 0  ;;  %v849_v38 = vpop.permute.xlu1 %848 }
 0x2e4   : > { %745 = vmatpush1.bf16.msra.mxu1 %v739_v28 }
 0x2e5   : > { %1418 = vmatprep.subr.bf16.mxu1 %v1496_v25 }
 0x2e7   : > { %1372 = vmatmul.mubr.msk.bf16.vlgmr.msra.gmra.mrb[4].mxu1 %vm612_vm6, %v732_v29 }
 0x2e8   : > { %1419 = vmatpush3.bf16.msra.mxu1 %v892_v31  ;;  %1420 = vmatprep.mubr.msk.bf16.mxu1 %vm1497_vm5, %v1496_v25  ;;  %v845_v25 = vadd.f32 %v843_v37, %v1664_v56  ;;  %v884_v52 = vpop.permute.xlu1 %883  ;;  %v1248_v37 = vpop.permute.xlu0 %1247 }
 0x2e9   : > { %1044 = vmatprep.subr.bf16.mxu1 %v1453_v32 }
 0x2ea   : > { %vm846_vm10 = vcmp.ge.f32.partialorder %v845_v25, 0.0  ;;  %v851_v39 = vmul.f32 %v849_v38, %v845_v25 }
 0x2ec   : > { %v852_v42 = vsel %vm846_vm10, %v845_v25, %v851_v39 }
 0x2ed   : > { %v878_v43 = vmul.f32 %v877_v41, %v852_v42 }
 0x2ef   : > { %1421 = vmatmul.mubr.msk.bf16.vlgmr.msra.gmra.mrb[8].mxu1 %vm886_vm9, %v880_v35  ;;  %v1028_v44 = vpack.c.bf16 %v878_v43, %v878_v43 }
 0x2f0   : > { %1045 = vmatpush1.bf16.msra.mxu1 %v1451_v36  ;;  %1076 = vmatprep.mubr.bf16.mxu1 %v1494_v0 }
 0x2f7   : > { %1387 = vmatmul.mubr.msk.bf16.vlgmr.msra.gmra.mrb[12].mxu1 %vm858_vm7, %v1028_v44 }
 0x2f8   : > { %1132 = vmatprep.mubr.bf16.mxu1 %v1494_v0 }
 0x3ba   : > { %v778_v47 = vpop.f32.mrb[4].mxu1 }
 0x3bb   : > { %v780_v48 = vpop.f32.mrb[5].mxu1  ;;  %v1086_v54 = vpack.c.bf16 %v778_v47, %v778_v47 }
 0x3bc   : > { %v1087_v49 = vpack.c.bf16 %v780_v48, %v780_v48  ;;  %v782_v50 = vpop.f32.mrb[6].mxu1 }
 0x3bd   : > { %v783_v51 = vpop.f32.mrb[7].mxu1  ;;  %v1145_v60 = vsel %vm616_vm4, %v1086_v54, 0 }
 0x3be   : > { %1390 = vmatprep.subr.msk.bf16.mxu0 %vm616_vm4, %v1087_v49 }
 0x3c2   : > { %v928_v53 = vpop.f32.mrb[8].mxu1 }
 0x3c3   : > { %v929_v55 = vadd.f32 %v928_v53, %v884_v52  ;;  %v1422_v56 = vpop.f32.mrb[9].mxu1 }
 0x3c4   : > { %v931_v57 = vpop.f32.mrb[10].mxu1 }
 0x3c5   : > { %v934_v58 = vpack.c.bf16 %v929_v55, %v929_v55  ;;  %v1423_v59 = vpop.f32.mrb[11].mxu1 }
 0x3c7   : > { %1384 = vmatmul.mubr.msk.bf16.vlgmr.msra.gmra.mrb[12].mxu0 %vm983_vm11, %v934_v58 }
 0x3c8   : > { %1151 = vmatpush1.bf16.msra.mxu0 %v1145_v60  ;;  %1182 = vmatprep.mubr.bf16.mxu0 %v1494_v0 }
 0x3ca   : > { %v1078_v61 = vpop.f32.mrb[12].mxu1 }
 0x3cb   : > { %v1089_v62 = vpack.c.bf16 %v1078_v61, %v1078_v61  ;;  %v1080_v63 = vpop.f32.mrb[13].mxu1 }
 0x3cc   : > { %v1090_v2 = vpack.c.bf16 %v1080_v63, %v1080_v63  ;;  %v1082_v3 = vpop.f32.mrb[14].mxu1 }
 0x3cd   : > { %v1083_v4 = vpop.f32.mrb[15].mxu1  ;;  %v1095_v5 = vsel %vm616_vm4, %v1089_v62, 0 }
 0x3ce   : > { %1388 = vmatprep.subr.msk.bf16.mxu1 %vm616_vm4, %v1090_v2 }
 0x3cf   : > { %1101 = vmatpush1.bf16.msra.mxu1 %v1095_v5  ;;  %1391 = vmatmul.mubr.msk.bf16.vlgmr.msra.gmra.mrb[16].mxu0 %vm612_vm6, %v1085_v7 }
 0x3d2   : > { %1389 = vmatmul.mubr.msk.bf16.vlgmr.msra.gmra.mrb[16].mxu1 %vm612_vm6, %v1088_v6 }
 0x3d3   : > { %1235 = vmatprep.mubr.bf16.mxu1 %v1494_v0  ;;  %v1191_v0 = vld [vmem:[%s1741_s13] sm:$0xf] }
 0x49a   : > { %v1021_v9 = vpop.f32.mrb[12].mxu0 }
 0x49b   : > { %v1192_v10 = vpack.c.bf16 %v1021_v9, %v1021_v9  ;;  %v1252_v11 = vmul.f32 %v1078_v61, %v1021_v9  ;;  %v1256_v12 = vmul.f32 %v1021_v9, %v778_v47  ;;  %v1023_v13 = vpop.f32.mrb[13].mxu0 }
 0x49c   : > { %v1193_v14 = vpack.c.bf16 %v1023_v13, %v1023_v13  ;;  %v1253_v15 = vmul.f32 %v1080_v63, %v1023_v13  ;;  %v1257_v16 = vmul.f32 %v1023_v13, %v780_v48  ;;  %v1025_v17 = vpop.f32.mrb[14].mxu0 }
 0x49d   : > { %v1026_v18 = vpop.f32.mrb[15].mxu0  ;;  %v1198_v19 = vsel %vm616_vm4, %v1192_v10, 0  ;;  %v1394_v30 = vmul.f32 -1.442695, %v1256_v12 }
 0x49e   : > { %1392 = vmatprep.subr.msk.bf16.mxu1 %vm616_vm4, %v1193_v14  ;;  %v1395_v31 = vmul.f32 -1.442695, %v1257_v16 }
 0x49f   : > { %1204 = vmatpush1.bf16.msra.mxu1 %v1198_v19  ;;  %1478 = vpow2.f32 %v1394_v30 }
 0x4a0   : > { %1480 = vpow2.f32 %v1395_v31 }
 0x4a2   : > { %1393 = vmatmul.mubr.msk.bf16.vlgmr.msra.gmra.mrb[20].mxu1 %vm612_vm6, %v1191_v0  ;;  %v1184_v22 = vpop.f32.mrb[16].mxu0 }
 0x4a3   : > { %v1186_v26 = vpop.f32.mrb[17].mxu0 }
 0x4a4   : > { %v1188_v28 = vpop.f32.mrb[18].mxu0 }
 0x4a5   : > { %v1134_v1 = vpop.f32.mrb[16].mxu1  ;;  %v1189_v29 = vpop.f32.mrb[19].mxu0 }
 0x4a6   : > { %v1136_v20 = vpop.f32.mrb[17].mxu1  ;;  %v1185_v23 = vadd.f32 %v1184_v22, %v1134_v1 }
 0x4a7   : > { %v1138_v21 = vpop.f32.mrb[18].mxu1  ;;  %v1187_v27 = vadd.f32 %v1186_v26, %v1136_v20 }
 0x4a8   : > { %v1139_v24 = vpop.f32.mrb[19].mxu1 }
 0x4a9   : > { %v1479_v32 = vpop.eup %1478 }
 0x4aa   : > { %v1481_v33 = vpop.eup %1480  ;;  %v1264_v34 = vadd.f32 1.0, %v1479_v32 }
 0x4ab   : > { %v1265_v35 = vadd.f32 1.0, %v1481_v33 }
 0x4ac   : > { %1482 = vrcp.f32 %v1264_v34 }
 0x4ad   : > { %1484 = vrcp.f32 %v1265_v35 }
 0x4b6   : > { %v1483_v45 = vpop.eup %1482 }
 0x4b7   : > { %v1485_v47 = vpop.eup %1484 }
 0x575   : > { %v1237_v36 = vpop.f32.mrb[20].mxu1 }
 0x576   : > { %v1244_v38 = vadd.f32 %v1237_v36, %v1185_v23  ;;  %v1239_v25 = vpop.f32.mrb[21].mxu1 }
 0x577   : > { %v1245_v39 = vadd.f32 %v1239_v25, %v1187_v27  ;;  %v1241_v40 = vpop.f32.mrb[22].mxu1 }
 0x578   : > { %v1250_v41 = vadd.f32 %v1248_v37, %v1244_v38  ;;  %v1242_v42 = vpop.f32.mrb[23].mxu1 }
 0x579   : > { %v1251_v43 = vadd.f32 %v1248_v37, %v1245_v39 }
 0x57a   : > { %v1254_v44 = vadd.f32 %v1252_v11, %v1250_v41 }
 0x57b   : > { %v1255_v46 = vadd.f32 %v1253_v15, %v1251_v43 }
 0x57c   : > { %v1270_v48 = vadd.f32 %v1483_v45, %v1254_v44 }
 0x57d   : > { %v1271_v49 = vadd.f32 %v1485_v47, %v1255_v46 }
 0x57e   : > { %1272 = vst [vmem:[%s528_s23] sm:$0xff] %v1270_v48 }
 0x57f   : > { %1273 = vst [vmem:[%s528_s23 + $0x8] sm:$0xff] %v1271_v49 }
 0x580 PF: > { %s25_s18 = sadd.s32 1, %s1492_s18  }
 0x581   : > { %p22_p4 = scmp.ge.s32.totalorder %s25_s18, 4  }
 0x583   :  { %24 = sbr.rel (!%p22_p4) target bundleno = 1 (0x1), region = 116 }

</bundles_post_ra>
